<compile_context>
chip_gen: v6e
topology: v6e:2x2x1
jax: 0.10.0
libtpu: 0.0.40
codegen_flags: <defaults>
</compile_context>

<pallas_src>
import functools

import jax
import jax.numpy as jnp
from jax import lax
from jax.experimental import pallas as pl
from jax.experimental.pallas import tpu as pltpu


def _round_up(n, m):
    return ((n + m - 1) // m) * m


def _device_tuning():
    """Per-generation tiling / VMEM / core-split policy (static, trace time)."""
    try:
        kind = jax.devices()[0].device_kind.lower()
    except Exception:  # pragma: no cover - defensive
        kind = ""
    if "v7" in kind:
        # 2 TensorCores/chip, only 64 MiB physical VMEM -> smaller blocks,
        # true core-parallel split of the N stream.
        return {"splits": 2, "block_bytes": 8 * 1024 * 1024,
                "vmem_limit": 48 * 1024 * 1024, "core_parallel": True}
    if ("v5" in kind) or ("v6" in kind):
        # 1 TensorCore/chip, 128 MiB physical VMEM -> big blocks, no split.
        return {"splits": 1, "block_bytes": 16 * 1024 * 1024,
                "vmem_limit": 64 * 1024 * 1024, "core_parallel": False}
    # Unknown / older generation: conservative single-core defaults.
    return {"splits": 1, "block_bytes": 8 * 1024 * 1024,
            "vmem_limit": 32 * 1024 * 1024, "core_parallel": False}


def _x_block_spec(block_shape, index_map, buffer_count):
    if buffer_count is None:
        return pl.BlockSpec(block_shape, index_map)
    # Deeper pipelining on the x stream (sweep 2-4, VMEM permitting).
    return pl.BlockSpec(block_shape, index_map,
                        pipeline_mode=pl.Buffered(int(buffer_count)))


# ---------------------------------------------------------------------------
# Path A: single-core chips (v5e/v6e). One pallas_call, fused epilogue.
# ---------------------------------------------------------------------------
def _emb_max_fused(x2d, w, b, tile_n, vmem_limit, buffer_count):
    N, D = x2d.shape
    n_blocks = pl.cdiv(N, tile_n)
    ragged = (n_blocks * tile_n) != N
    acc_dtype = x2d.dtype
    itemsize = jnp.dtype(x2d.dtype).itemsize

    def kernel(x_ref, w_ref, b_ref, prob_ref, hat_ref, acc_ref):
        t = pl.program_id(0)

        @pl.when(t == 0)
        def _():
            acc_ref[...] = jnp.full(acc_ref.shape, -jnp.inf, acc_ref.dtype)

        xv = x_ref[...]                     # native dtype; bf16 stays bf16
        base = t * tile_n

        def slab_update(vals):
            # Sublane-split reshape (multiples of 8) is layout-preserving;
            # the axis-0 max is pure VALU into the resident (8, D) acc.
            slab = jnp.max(vals.reshape(tile_n // 8, 8, D), axis=0)
            acc_ref[...] = jnp.maximum(acc_ref[...], slab)

        if ragged:
            @pl.when(base + tile_n <= N)    # interior tiles: no mask cost
            def _():
                slab_update(xv)

            @pl.when(base + tile_n > N)     # only the last (ragged) tile
            def _():
                rows = lax.broadcasted_iota(jnp.int32, (tile_n, 1), 0) + base
                neg = jnp.array(-jnp.inf, dtype=xv.dtype)
                slab_update(jnp.where(rows < N, xv, neg))
        else:
            slab_update(xv)

        @pl.when(t == n_blocks - 1)
        def _():
            # Fused epilogue: 8->1 cross-sublane max (XLU), D-length dot,
            # sigmoid + threshold. Avoids a second dispatch / HBM round trip.
            z = jnp.max(acc_ref[...].astype(jnp.float32), axis=0, keepdims=True)
            logit = (jnp.sum(z * w_ref[...].astype(jnp.float32),
                             axis=-1, keepdims=True)
                     + b_ref[...].astype(jnp.float32))
            p = jax.nn.sigmoid(logit)
            prob_ref[...] = p
            hat_ref[...] = (p >= 0.5).astype(jnp.float32)

    cost = pl.CostEstimate(
        flops=int(N) * int(D) + 2 * int(D),
        transcendentals=1,
        bytes_accessed=int(N) * int(D) * itemsize + int(D) * 4 + 16,
    )

    y_prob, y_hat = pl.pallas_call(
        kernel,
        out_shape=(jax.ShapeDtypeStruct((1, 1), jnp.float32),
                   jax.ShapeDtypeStruct((1, 1), jnp.float32)),
        grid_spec=pltpu.PrefetchScalarGridSpec(
            num_scalar_prefetch=0,
            grid=(n_blocks,),
            in_specs=[
                _x_block_spec((tile_n, D), lambda t: (t, 0), buffer_count),
                pl.BlockSpec((1, D), lambda t: (0, 0)),   # w: resident
                pl.BlockSpec((1, 1), lambda t: (0, 0)),   # b: resident
            ],
            out_specs=(
                pl.BlockSpec((1, 1), lambda t: (0, 0)),
                pl.BlockSpec((1, 1), lambda t: (0, 0)),
            ),
            scratch_shapes=[pltpu.VMEM((8, D), acc_dtype)],
        ),
        compiler_params=pltpu.CompilerParams(
            dimension_semantics=("arbitrary",),
            vmem_limit_bytes=vmem_limit,
        ),
        cost_estimate=cost,
    )(x2d, w, b.reshape(1, 1))
    return y_prob, y_hat


# ---------------------------------------------------------------------------
# Path B: multi-TensorCore chips (v7x). Core-split partial max, tiny epilogue.
# ---------------------------------------------------------------------------
def _emb_max_split(x2d, w, b, tile_n, splits, vmem_limit, core_parallel,
                   buffer_count):
    N, D = x2d.shape
    acc_dtype = x2d.dtype
    itemsize = jnp.dtype(x2d.dtype).itemsize

    # Re-balance tile_n so the tile count divides evenly across the splits
    # (avoids phantom-tile re-DMA on the critical split). The clamp + mask
    # below remains as a fully general fallback.
    n_real = pl.cdiv(N, tile_n)
    total = _round_up(max(n_real, splits), splits)
    tile_n = max(8, _round_up(pl.cdiv(N, total), 8))
    tile_n = min(tile_n, _round_up(N, 8))
    n_real = pl.cdiv(N, tile_n)
    tiles_per_split = total // splits
    ragged = (splits * tiles_per_split * tile_n) != N

    def x_index_map(c, t):
        # Any (rare) phantom trailing tile is clamped onto the last real
        # block; its rows are fully masked to -inf via the *unclamped* index.
        return (jnp.minimum(c * tiles_per_split + t, n_real - 1), 0)

    def kernel(x_ref, o_ref):
        c = pl.program_id(0)
        t = pl.program_id(1)

        @pl.when(t == 0)
        def _():
            o_ref[...] = jnp.full(o_ref.shape, -jnp.inf, o_ref.dtype)

        xv = x_ref[...]                     # native dtype; no f32 cast
        base = (c * tiles_per_split + t) * tile_n

        def slab_update(vals):
            slab = jnp.max(vals.reshape(tile_n // 8, 8, D), axis=0)
            o_ref[...] = jnp.maximum(o_ref[...], slab[None, :, :])

        if ragged:
            @pl.when(base + tile_n <= N)
            def _():
                slab_update(xv)

            @pl.when(base + tile_n > N)
            def _():
                rows = lax.broadcasted_iota(jnp.int32, (tile_n, 1), 0) + base
                neg = jnp.array(-jnp.inf, dtype=xv.dtype)
                slab_update(jnp.where(rows < N, xv, neg))
        else:
            slab_update(xv)

    cost = pl.CostEstimate(
        flops=int(N) * int(D),
        transcendentals=0,
        bytes_accessed=int(N) * int(D) * itemsize
        + splits * 8 * int(D) * itemsize,
    )

    if core_parallel:
        dims = (getattr(pltpu, "CORE_PARALLEL", pltpu.PARALLEL), pltpu.ARBITRARY)
    else:
        dims = ("parallel", "arbitrary")

    partial = pl.pallas_call(
        kernel,
        out_shape=jax.ShapeDtypeStruct((splits, 8, D), acc_dtype),
        grid_spec=pltpu.PrefetchScalarGridSpec(
            num_scalar_prefetch=0,
            grid=(splits, tiles_per_split),
            in_specs=[_x_block_spec((tile_n, D), x_index_map, buffer_count)],
            out_specs=pl.BlockSpec((1, 8, D), lambda c, t: (c, 0, 0)),
        ),
        compiler_params=pltpu.CompilerParams(
            dimension_semantics=dims,
            vmem_limit_bytes=vmem_limit,
        ),
        cost_estimate=cost,
    )(x2d)

    # Tiny O(D) epilogue in f32 (fused by XLA; negligible vs. the HBM stream).
    z = jnp.max(partial.astype(jnp.float32).reshape(splits * 8, D),
                axis=0, keepdims=True)
    logit = (jnp.sum(z * w.astype(jnp.float32), axis=-1, keepdims=True)
             + b.astype(jnp.float32).reshape(1, 1))
    y_prob = jax.nn.sigmoid(logit)
    y_hat = (y_prob >= 0.5).astype(jnp.float32)
    return y_prob, y_hat


# ---------------------------------------------------------------------------
# Public forward
# ---------------------------------------------------------------------------
def emb_max_forward(x, w, b, *, max_tile_rows=None, force_splits=None,
                    x_buffer_count=None):
    """MIL max-pool + linear(D->1) + sigmoid.

    x: (1, N, D) instance embeddings (f32 or bf16)
    w: (1, D)    classifier weight (PyTorch nn.Linear(D, 1).weight layout)
    b: (1,)      classifier bias
    Returns (Y_prob, Y_hat), each (1, 1) float32.
    """
    x2d = x[0]  # squeeze(0)
    N, D = x2d.shape
    tune = _device_tuning()
    splits = tune["splits"] if force_splits is None else int(force_splits)

    # Tile policy: biggest instance tile within the per-generation block-byte
    # budget, sized by the *actual* itemsize (bf16 tiles hold 2x the rows).
    itemsize = jnp.dtype(x2d.dtype).itemsize
    rows_fit = max(8, tune["block_bytes"] // max(1, D * itemsize))
    auto_tile = max(8, (rows_fit // 8) * 8)
    if max_tile_rows is not None:
        auto_tile = max(8, (min(auto_tile, int(max_tile_rows)) // 8) * 8)
    tile_n = min(auto_tile, _round_up(N, 8))

    if splits <= 1:
        return _emb_max_fused(x2d, w, b, tile_n, tune["vmem_limit"],
                              x_buffer_count)
    return _emb_max_split(x2d, w, b, tile_n, splits, tune["vmem_limit"],
                          tune["core_parallel"], x_buffer_count)


def _reference(x, w, b):
    z = jnp.max(x[0], axis=0, keepdims=True)
    logit = z @ w.T + b
    p = jax.nn.sigmoid(logit)
    return p, (p >= 0.5).astype(jnp.float32)


if __name__ == "__main__":
    # Small, module-consistent shapes: bag of N=300 instances, embed_size=256
    # (module default is 1024; kept small for the demo). N is intentionally
    # not a multiple of the tile to exercise the ragged/phantom-tile masking.
    N, D = 300, 256
    key = jax.random.PRNGKey(0)
    kx, kw, kb = jax.random.split(key, 3)

    x = jax.random.normal(kx, (1, N, D), dtype=jnp.float32)

    # nn.Linear(D, 1)-style init: weight (1, D), bias (1,), U(-1/sqrt(D), 1/sqrt(D)).
    bound = 1.0 / jnp.sqrt(jnp.float32(D))
    w = jax.random.uniform(kw, (1, D), minval=-bound, maxval=bound,
                           dtype=jnp.float32)
    b = jax.random.uniform(kb, (1,), minval=-bound, maxval=bound,
                           dtype=jnp.float32)

    ref_prob, ref_hat = _reference(x, w, b)

    # 1) Default auto-tiled path (fused single-call kernel on 1-TC chips).
    y_prob, y_hat = jax.jit(emb_max_forward)(x, w, b)
    jax.block_until_ready((y_prob, y_hat))
    assert y_prob.shape == (1, 1) and y_hat.shape == (1, 1)
    assert jnp.allclose(y_prob, ref_prob, atol=1e-5, rtol=1e-5)
    assert jnp.array_equal(y_hat, ref_hat)

    # 2) Small forced tiles: multi-tile pipeline + pl.when-gated ragged mask.
    fwd_small = jax.jit(functools.partial(emb_max_forward, max_tile_rows=64))
    p2, h2 = fwd_small(x, w, b)
    jax.block_until_ready((p2, h2))
    assert jnp.allclose(p2, ref_prob, atol=1e-5, rtol=1e-5)
    assert jnp.array_equal(h2, ref_hat)

    # 3) bf16 input: native-dtype (cast-free) streaming max path.
    xb = x.astype(jnp.bfloat16)
    ref_prob_b, ref_hat_b = _reference(xb.astype(jnp.float32), w, b)
    p3, h3 = jax.jit(functools.partial(emb_max_forward, max_tile_rows=64))(xb, w, b)
    jax.block_until_ready((p3, h3))
    assert jnp.allclose(p3, ref_prob_b, atol=1e-5, rtol=1e-5)
    assert jnp.array_equal(h3, ref_hat_b)

    # 4) Forced 2-way split path (the v7x code path; plain "parallel" here on
    #    single-core chips, so it is safe to exercise for correctness).
    p4, h4 = jax.jit(functools.partial(emb_max_forward, max_tile_rows=64,
                                       force_splits=2))(x, w, b)
    jax.block_until_ready((p4, h4))
    assert jnp.allclose(p4, ref_prob, atol=1e-5, rtol=1e-5)
    assert jnp.array_equal(h4, ref_hat)

    print("KERNEL_OK")
</pallas_src>

<mosaic_0001>
module attributes {stable_mosaic.version = 11 : i64} {
  func.func @kernel(%arg0: i32, %arg1: memref<304x256xf32, #tpu.memory_space<vmem>>, %arg2: memref<1x256xf32, #tpu.memory_space<vmem>>, %arg3: memref<1x1xf32, #tpu.memory_space<vmem>>, %arg4: memref<1x1xf32, #tpu.memory_space<vmem>>, %arg5: memref<1x1xf32, #tpu.memory_space<vmem>>, %arg6: memref<8x256xf32, #tpu.memory_space<vmem>>) attributes {dimension_semantics = [#tpu.dimension_semantics<arbitrary>], iteration_bounds = array<i64: 1>, scalar_prefetch = 0 : i64, scratch_operands = 1 : i64, tpu.core_type = #tpu.core_type<tc>, window_params = [{transform_indices = @transform_0, window_bounds = array<i64: 304, 256>}, {pipeline_mode = #tpu.pipeline_mode<synchronous>, transform_indices = @transform_1, window_bounds = array<i64: 1, 256>}, {pipeline_mode = #tpu.pipeline_mode<synchronous>, transform_indices = @transform_2, window_bounds = array<i64: 1, 1>}, {pipeline_mode = #tpu.pipeline_mode<synchronous>, transform_indices = @transform_3, window_bounds = array<i64: 1, 1>}, {pipeline_mode = #tpu.pipeline_mode<synchronous>, transform_indices = @transform_4, window_bounds = array<i64: 1, 1>}]} {
    %c0_i32 = arith.constant 0 : i32
    %0 = arith.cmpi eq, %arg0, %c0_i32 : i32
    %1 = arith.extui %0 : i1 to i32
    %c0_i32_0 = arith.constant 0 : i32
    %2 = arith.cmpi ne, %1, %c0_i32_0 : i32
    scf.if %2 {
      %cst = arith.constant 0xFF800000 : f32
      %16 = vector.broadcast %cst : f32 to vector<8x256xf32>
      %c0_9 = arith.constant 0 : index
      %c0_10 = arith.constant 0 : index
      %17 = vector.load %arg6[%c0_9, %c0_10] : memref<8x256xf32, #tpu.memory_space<vmem>>, vector<8x256xf32>
      tpu.vector_store %arg6[%c0_9, %c0_10], %16 {strides = array<i32>} : memref<8x256xf32, #tpu.memory_space<vmem>>, vector<8x256xf32>,
    } else {
    }
    %c0 = arith.constant 0 : index
    %c0_1 = arith.constant 0 : index
    %3 = vector.load %arg1[%c0, %c0_1] : memref<304x256xf32, #tpu.memory_space<vmem>>, vector<304x256xf32>
    %c304_i32 = arith.constant 304 : i32
    %4 = arith.muli %arg0, %c304_i32 : i32
    %c304_i32_2 = arith.constant 304 : i32
    %5 = arith.addi %4, %c304_i32_2 : i32
    %c300_i32 = arith.constant 300 : i32
    %6 = arith.cmpi sle, %5, %c300_i32 : i32
    %7 = arith.extui %6 : i1 to i32
    %c0_i32_3 = arith.constant 0 : i32
    %8 = arith.cmpi ne, %7, %c0_i32_3 : i32
    scf.if %8 {
      %16 = vector.shape_cast %3 : vector<304x256xf32> to vector<38x8x256xf32>
      %cst = arith.constant dense<0xFF800000> : vector<8x256xf32>
      %17 = vector.multi_reduction <maximumf>, %16, %cst [0] : vector<38x8x256xf32> to vector<8x256xf32>
      %c0_9 = arith.constant 0 : index
      %c0_10 = arith.constant 0 : index
      %18 = vector.load %arg6[%c0_9, %c0_10] : memref<8x256xf32, #tpu.memory_space<vmem>>, vector<8x256xf32>
      %19 = arith.maximumf %18, %17 : vector<8x256xf32>
      %c0_11 = arith.constant 0 : index
      %c0_12 = arith.constant 0 : index
      %20 = vector.load %arg6[%c0_11, %c0_12] : memref<8x256xf32, #tpu.memory_space<vmem>>, vector<8x256xf32>
      tpu.vector_store %arg6[%c0_11, %c0_12], %19 {strides = array<i32>} : memref<8x256xf32, #tpu.memory_space<vmem>>, vector<8x256xf32>,
    } else {
    }
    %c304_i32_4 = arith.constant 304 : i32
    %9 = arith.addi %4, %c304_i32_4 : i32
    %c300_i32_5 = arith.constant 300 : i32
    %10 = arith.cmpi sgt, %9, %c300_i32_5 : i32
    %11 = arith.extui %10 : i1 to i32
    %c0_i32_6 = arith.constant 0 : i32
    %12 = arith.cmpi ne, %11, %c0_i32_6 : i32
    scf.if %12 {
      %16 = tpu.iota {dimensions = array<i32: 0>} : vector<304x1xi32>
      %17 = vector.broadcast %4 : i32 to vector<304x1xi32>
      %18 = arith.addi %16, %17 : vector<304x1xi32>
      %c300_i32_9 = arith.constant 300 : i32
      %19 = vector.broadcast %c300_i32_9 : i32 to vector<304x1xi32>
      %20 = arith.cmpi slt, %18, %19 : vector<304x1xi32>
      %cst = arith.constant 0xFF800000 : f32
      %21 = vector.shape_cast %20 : vector<304x1xi1> to vector<304x1xi1>
      %22 = vector.broadcast %21 : vector<304x1xi1> to vector<304x256xi1>
      %23 = vector.broadcast %cst : f32 to vector<304x256xf32>
      %24 = arith.select %22, %3, %23 : vector<304x256xi1>, vector<304x256xf32>
      %25 = vector.shape_cast %24 : vector<304x256xf32> to vector<38x8x256xf32>
      %cst_10 = arith.constant dense<0xFF800000> : vector<8x256xf32>
      %26 = vector.multi_reduction <maximumf>, %25, %cst_10 [0] : vector<38x8x256xf32> to vector<8x256xf32>
      %c0_11 = arith.constant 0 : index
      %c0_12 = arith.constant 0 : index
      %27 = vector.load %arg6[%c0_11, %c0_12] : memref<8x256xf32, #tpu.memory_space<vmem>>, vector<8x256xf32>
      %28 = arith.maximumf %27, %26 : vector<8x256xf32>
      %c0_13 = arith.constant 0 : index
      %c0_14 = arith.constant 0 : index
      %29 = vector.load %arg6[%c0_13, %c0_14] : memref<8x256xf32, #tpu.memory_space<vmem>>, vector<8x256xf32>
      tpu.vector_store %arg6[%c0_13, %c0_14], %28 {strides = array<i32>} : memref<8x256xf32, #tpu.memory_space<vmem>>, vector<8x256xf32>,
    } else {
    }
    %c0_i32_7 = arith.constant 0 : i32
    %13 = arith.cmpi eq, %arg0, %c0_i32_7 : i32
    %14 = arith.extui %13 : i1 to i32
    %c0_i32_8 = arith.constant 0 : i32
    %15 = arith.cmpi ne, %14, %c0_i32_8 : i32
    scf.if %15 {
      %c0_9 = arith.constant 0 : index
      %c0_10 = arith.constant 0 : index
      %16 = vector.load %arg6[%c0_9, %c0_10] : memref<8x256xf32, #tpu.memory_space<vmem>>, vector<8x256xf32>
      %cst = arith.constant dense<0xFF800000> : vector<256xf32>
      %17 = vector.multi_reduction <maximumf>, %16, %cst [0] : vector<8x256xf32> to vector<256xf32>
      %18 = vector.shape_cast %17 : vector<256xf32> to vector<1x256xf32>
      %c0_11 = arith.constant 0 : index
      %c0_12 = arith.constant 0 : index
      %19 = vector.load %arg2[%c0_11, %c0_12] : memref<1x256xf32, #tpu.memory_space<vmem>>, vector<1x256xf32>
      %20 = arith.mulf %18, %19 : vector<1x256xf32>
      %cst_13 = arith.constant dense<0.000000e+00> : vector<1xf32>
      %21 = vector.multi_reduction <add>, %20, %cst_13 [1] : vector<1x256xf32> to vector<1xf32>
      %22 = vector.shape_cast %21 : vector<1xf32> to vector<1x1xf32>
      %c0_14 = arith.constant 0 : index
      %c0_15 = arith.constant 0 : index
      %23 = vector.load %arg3[%c0_14, %c0_15] : memref<1x1xf32, #tpu.memory_space<vmem>>, vector<1x1xf32>
      %24 = arith.addf %22, %23 : vector<1x1xf32>
      %25 = arith.negf %24 : vector<1x1xf32>
      %26 = math.exp %25 : vector<1x1xf32>
      %cst_16 = arith.constant 1.000000e+00 : f32
      %27 = vector.broadcast %cst_16 : f32 to vector<1x1xf32>
      %28 = arith.addf %27, %26 : vector<1x1xf32>
      %29 = arith.divf %27, %28 : vector<1x1xf32>
      %c0_17 = arith.constant 0 : index
      %c0_18 = arith.constant 0 : index
      %30 = vector.load %arg4[%c0_17, %c0_18] : memref<1x1xf32, #tpu.memory_space<vmem>>, vector<1x1xf32>
      tpu.vector_store %arg4[%c0_17, %c0_18], %29 {strides = array<i32>} : memref<1x1xf32, #tpu.memory_space<vmem>>, vector<1x1xf32>,
      %cst_19 = arith.constant 5.000000e-01 : f32
      %31 = vector.broadcast %cst_19 : f32 to vector<1x1xf32>
      %32 = arith.cmpf oge, %29, %31 : vector<1x1xf32>
      %33 = arith.extui %32 : vector<1x1xi1> to vector<1x1xi32>
      %34 = arith.sitofp %33 : vector<1x1xi32> to vector<1x1xf32>
      %c0_20 = arith.constant 0 : index
      %c0_21 = arith.constant 0 : index
      %35 = vector.load %arg5[%c0_20, %c0_21] : memref<1x1xf32, #tpu.memory_space<vmem>>, vector<1x1xf32>
      tpu.vector_store %arg5[%c0_20, %c0_21], %34 {strides = array<i32>} : memref<1x1xf32, #tpu.memory_space<vmem>>, vector<1x1xf32>,
    } else {
    }
    return
  }
  func.func @transform_0(%arg0: i32) -> (i32, i32) {
    %c0_i32 = arith.constant 0 : i32
    %c0_i32_0 = arith.constant 0 : i32
    return %arg0, %c0_i32 : i32, i32
  }
  func.func @transform_1(%arg0: i32) -> (i32, i32) {
    %c0_i32 = arith.constant 0 : i32
    %c0_i32_0 = arith.constant 0 : i32
    %c0_i32_1 = arith.constant 0 : i32
    return %c0_i32, %c0_i32_0 : i32, i32
  }
  func.func @transform_2(%arg0: i32) -> (i32, i32) {
    %c0_i32 = arith.constant 0 : i32
    %c0_i32_0 = arith.constant 0 : i32
    %c0_i32_1 = arith.constant 0 : i32
    return %c0_i32, %c0_i32_0 : i32, i32
  }
  func.func @transform_3(%arg0: i32) -> (i32, i32) {
    %c0_i32 = arith.constant 0 : i32
    %c0_i32_0 = arith.constant 0 : i32
    %c0_i32_1 = arith.constant 0 : i32
    return %c0_i32, %c0_i32_0 : i32, i32
  }
  func.func @transform_4(%arg0: i32) -> (i32, i32) {
    %c0_i32 = arith.constant 0 : i32
    %c0_i32_0 = arith.constant 0 : i32
    %c0_i32_1 = arith.constant 0 : i32
    return %c0_i32, %c0_i32_0 : i32, i32
  }
}

</mosaic_0001>

<bundles_post_ra>
// kernel: emb_max_forward.1
= control target key start
LH: loop header
LB: loop body
LE: loop exit
PB: predicated region body
PF: predicated region fallthrough
CT: control target
= control target key end

     0   :  { %s942_s0 = inlined_call_operand.vmem [shape: f32[300,256], index: 0, kind: input, shape index: {}]   ;;  %s943_s1 = inlined_call_operand.vmem [shape: f32[1,256], index: 1, kind: input, shape index: {}]   ;;  %s944_s2 = inlined_call_operand.<no memory space> [shape: f32[1,1], index: 2, kind: input, shape index: {}]   ;;  %s945_s3 = inlined_call_operand.hbm [shape: f32[1,1], index: 3, kind: output, shape index: {0}]   ;;  %s946_s4 = inlined_call_operand.hbm [shape: f32[1,1], index: 4, kind: output, shape index: {1}]  }
   0x1   :  { %v10_v0 = vstv %s944_s2 }
   0x2   :  { %11 = vst [vmem:[#allocation3] sm:$0x1] %v10_v0 }
   0x3   :  { %12 = vsyncpa [#allocation5], 0  ;;  %v34_v1 = vld [vmem:[%s942_s0 + $0x40] sm:$0xff]  ;;  %v35_v2 = vld [vmem:[%s942_s0 + $0x48] sm:$0xff] }
   0x4   :  { %v36_v3 = vld [vmem:[%s942_s0 + $0x50] sm:$0xff]  ;;  %v37_v4 = vld [vmem:[%s942_s0 + $0x58] sm:$0xff]  ;;  %v38_v7 = vld [vmem:[%s942_s0 + $0x60] sm:$0xff] }
   0x5   :  { %v462_v5 = vmax.f32 %v36_v3, %v34_v1  ;;  %v499_v6 = vmax.f32 %v37_v4, %v35_v2  ;;  %v39_v8 = vld [vmem:[%s942_s0 + $0x68] sm:$0xff]  ;;  %v40_v9 = vld [vmem:[%s942_s0 + $0x70] sm:$0xff]  ;;  %v41_v10 = vld [vmem:[%s942_s0 + $0x78] sm:$0xff] }
   0x6   :  { %v42_v13 = vld [vmem:[%s942_s0 + $0x80] sm:$0xff]  ;;  %v43_v14 = vld [vmem:[%s942_s0 + $0x88] sm:$0xff]  ;;  %v44_v17 = vld [vmem:[%s942_s0 + $0x90] sm:$0xff] }
   0x7   :  { %v463_v11 = vmax.f32 %v38_v7, %v462_v5  ;;  %v500_v12 = vmax.f32 %v39_v8, %v499_v6  ;;  %v45_v18 = vld [vmem:[%s942_s0 + $0x98] sm:$0xff]  ;;  %v46_v21 = vld [vmem:[%s942_s0 + $0xa0] sm:$0xff]  ;;  %v47_v22 = vld [vmem:[%s942_s0 + $0xa8] sm:$0xff] }
   0x8   :  { %v48_v25 = vld [vmem:[%s942_s0 + $0xb0] sm:$0xff]  ;;  %v49_v26 = vld [vmem:[%s942_s0 + $0xb8] sm:$0xff]  ;;  %v50_v29 = vld [vmem:[%s942_s0 + $0xc0] sm:$0xff] }
   0x9   :  { %v464_v15 = vmax.f32 %v40_v9, %v463_v11  ;;  %v501_v16 = vmax.f32 %v41_v10, %v500_v12  ;;  %v51_v30 = vld [vmem:[%s942_s0 + $0xc8] sm:$0xff]  ;;  %v52_v33 = vld [vmem:[%s942_s0 + $0xd0] sm:$0xff]  ;;  %v53_v34 = vld [vmem:[%s942_s0 + $0xd8] sm:$0xff] }
   0xa   :  { %v54_v37 = vld [vmem:[%s942_s0 + $0xe0] sm:$0xff]  ;;  %v55_v38 = vld [vmem:[%s942_s0 + $0xe8] sm:$0xff]  ;;  %v56_v41 = vld [vmem:[%s942_s0 + $0xf0] sm:$0xff] }
   0xb   :  { %v465_v19 = vmax.f32 %v42_v13, %v464_v15  ;;  %v502_v20 = vmax.f32 %v43_v14, %v501_v16  ;;  %v57_v42 = vld [vmem:[%s942_s0 + $0xf8] sm:$0xff]  ;;  %v58_v45 = vld [vmem:[%s942_s0 + $0x100] sm:$0xff]  ;;  %v59_v46 = vld [vmem:[%s942_s0 + $0x108] sm:$0xff] }
   0xc   :  { %v60_v49 = vld [vmem:[%s942_s0 + $0x110] sm:$0xff]  ;;  %v61_v50 = vld [vmem:[%s942_s0 + $0x118] sm:$0xff] }
   0xd   :  { %v466_v23 = vmax.f32 %v44_v17, %v465_v19  ;;  %v503_v24 = vmax.f32 %v45_v18, %v502_v20 }
   0xf   :  { %v467_v27 = vmax.f32 %v46_v21, %v466_v23  ;;  %v504_v28 = vmax.f32 %v47_v22, %v503_v24 }
  0x11   :  { %v468_v31 = vmax.f32 %v48_v25, %v467_v27  ;;  %v505_v32 = vmax.f32 %v49_v26, %v504_v28 }
  0x13   :  { %v469_v35 = vmax.f32 %v50_v29, %v468_v31  ;;  %v506_v36 = vmax.f32 %v51_v30, %v505_v32 }
  0x15   :  { %v470_v39 = vmax.f32 %v52_v33, %v469_v35  ;;  %v507_v40 = vmax.f32 %v53_v34, %v506_v36 }
  0x17   :  { %v471_v43 = vmax.f32 %v54_v37, %v470_v39  ;;  %v508_v44 = vmax.f32 %v55_v38, %v507_v40 }
  0x19   :  { %v472_v47 = vmax.f32 %v56_v41, %v471_v43  ;;  %v509_v48 = vmax.f32 %v57_v42, %v508_v44 }
  0x1a   :  { %13 = vsyncpa [#allocation7], 0  ;;  %v62_v53 = vld [vmem:[%s942_s0 + $0x120] sm:$0xff]  ;;  %v63_v54 = vld [vmem:[%s942_s0 + $0x128] sm:$0xff]  ;;  %v192_v37 = vlaneseq  ;;  %vm571_vm1 = vcmask 1040384   ;;  %vm585_vm2 = vcmask 0  }
  0x1b   :  { %v473_v51 = vmax.f32 %v58_v45, %v472_v47  ;;  %v510_v52 = vmax.f32 %v59_v46, %v509_v48  ;;  %v64_v57 = vld [vmem:[%s942_s0 + $0x130] sm:$0xff]  ;;  %v65_v58 = vld [vmem:[%s942_s0 + $0x138] sm:$0xff]  ;;  %v66_v61 = vld [vmem:[%s942_s0 + $0x140] sm:$0xff]  ;;  %s673_s9 = smov [#allocation6]  }
  0x1c   :  { %v67_v62 = vld [vmem:[%s942_s0 + $0x148] sm:$0xff]  ;;  %v68_v1 = vld [vmem:[%s942_s0 + $0x150] sm:$0xff]  ;;  %v69_v2 = vld [vmem:[%s942_s0 + $0x158] sm:$0xff]  ;;  %v193_v46 = vshrl.u32 %v192_v37, 7  ;;  %s607_s10 = sshll.u32 %s673_s9, 4  ;;  %s608_s10 = int_to_ptr.vmem [resolvable:$true] %s607_s10 }
  0x1d   :  { %v474_v55 = vmax.f32 %v60_v49, %v473_v51  ;;  %v511_v56 = vmax.f32 %v61_v50, %v510_v52  ;;  %v70_v5 = vld [vmem:[%s942_s0 + $0x160] sm:$0xff]  ;;  %v71_v6 = vld [vmem:[%s942_s0 + $0x168] sm:$0xff]  ;;  %v72_v9 = vld [vmem:[%s942_s0 + $0x170] sm:$0xff] }
  0x1e   :  { %v73_v10 = vld [vmem:[%s942_s0 + $0x178] sm:$0xff]  ;;  %v74_v13 = vld [vmem:[%s942_s0 + $0x180] sm:$0xff]  ;;  %v75_v14 = vld [vmem:[%s942_s0 + $0x188] sm:$0xff] }
  0x1f   :  { %v475_v59 = vmax.f32 %v62_v53, %v474_v55  ;;  %v512_v60 = vmax.f32 %v63_v54, %v511_v56  ;;  %v76_v17 = vld [vmem:[%s942_s0 + $0x190] sm:$0xff]  ;;  %v77_v18 = vld [vmem:[%s942_s0 + $0x198] sm:$0xff]  ;;  %v78_v21 = vld [vmem:[%s942_s0 + $0x1a0] sm:$0xff]  ;;  %v230_v55 = vadd.s32 296, %v193_v46 }
  0x20   :  { %v79_v22 = vld [vmem:[%s942_s0 + $0x1a8] sm:$0xff]  ;;  %v80_v25 = vld [vmem:[%s942_s0 + $0x1b0] sm:$0xff]  ;;  %v81_v26 = vld [vmem:[%s942_s0 + $0x1b8] sm:$0xff] }
  0x21   :  { %v476_v63 = vmax.f32 %v64_v57, %v475_v59  ;;  %v513_v0 = vmax.f32 %v65_v58, %v512_v60  ;;  %v82_v29 = vld [vmem:[%s942_s0 + $0x1c0] sm:$0xff]  ;;  %v83_v30 = vld [vmem:[%s942_s0 + $0x1c8] sm:$0xff]  ;;  %v84_v33 = vld [vmem:[%s942_s0 + $0x1d0] sm:$0xff]  ;;  %vm307_vm0 = vcmp.lt.s32.totalorder %v230_v55, 300 }
  0x22   :  { %v85_v34 = vld [vmem:[%s942_s0 + $0x1d8] sm:$0xff]  ;;  %v86_v38 = vld [vmem:[%s942_s0 + $0x1e0] sm:$0xff]  ;;  %v87_v39 = vld [vmem:[%s942_s0 + $0x1e8] sm:$0xff] }
  0x23   :  { %v477_v3 = vmax.f32 %v66_v61, %v476_v63  ;;  %v514_v4 = vmax.f32 %v67_v62, %v513_v0  ;;  %v88_v42 = vld [vmem:[%s942_s0 + $0x1f0] sm:$0xff]  ;;  %v89_v43 = vld [vmem:[%s942_s0 + $0x1f8] sm:$0xff]  ;;  %v90_v47 = vld [vmem:[%s942_s0 + $0x200] sm:$0xff] }
  0x24   :  { %v91_v48 = vld [vmem:[%s942_s0 + $0x208] sm:$0xff]  ;;  %v92_v51 = vld [vmem:[%s942_s0 + $0x210] sm:$0xff]  ;;  %v93_v52 = vld [vmem:[%s942_s0 + $0x218] sm:$0xff] }
  0x25   :  { %v478_v7 = vmax.f32 %v68_v1, %v477_v3  ;;  %v515_v8 = vmax.f32 %v69_v2, %v514_v4  ;;  %v94_v56 = vld [vmem:[%s942_s0 + $0x220] sm:$0xff]  ;;  %v95_v57 = vld [vmem:[%s942_s0 + $0x228] sm:$0xff]  ;;  %v96_v62 = vld [vmem:[%s942_s0 + $0x230] sm:$0xff] }
  0x26   :  { %v26_v60 = vld [vmem:[%s942_s0] sm:$0xff]  ;;  %v27_v61 = vld [vmem:[%s942_s0 + $0x8] sm:$0xff]  ;;  %v97_v63 = vld [vmem:[%s942_s0 + $0x238] sm:$0xff] }
  0x27   :  { %v479_v11 = vmax.f32 %v70_v5, %v478_v7  ;;  %v516_v12 = vmax.f32 %v71_v6, %v515_v8  ;;  %v30_v0 = vld [vmem:[%s942_s0 + $0x20] sm:$0xff]  ;;  %v100_v3 = vld [vmem:[%s942_s0 + $0x250] sm:$0xff]  ;;  %v101_v4 = vld [vmem:[%s942_s0 + $0x258] sm:$0xff] }
  0x28   :  { %v31_v5 = vld [vmem:[%s942_s0 + $0x28] sm:$0xff]  ;;  %v98_v6 = vld [vmem:[%s942_s0 + $0x240] sm:$0xff]  ;;  %v28_v8 = vld [vmem:[%s942_s0 + $0x10] sm:$0xff] }
  0x29   :  { %v480_v15 = vmax.f32 %v72_v9, %v479_v11  ;;  %v517_v16 = vmax.f32 %v73_v10, %v516_v12  ;;  %v99_v7 = vld [vmem:[%s942_s0 + $0x248] sm:$0xff]  ;;  %v29_v11 = vld [vmem:[%s942_s0 + $0x18] sm:$0xff]  ;;  %v32_v12 = vld [vmem:[%s942_s0 + $0x30] sm:$0xff] }
  0x2b   :  { %v481_v19 = vmax.f32 %v74_v13, %v480_v15  ;;  %v518_v20 = vmax.f32 %v75_v14, %v517_v16  ;;  %v33_v13 = vld [vmem:[%s942_s0 + $0x38] sm:$0xff]  ;;  %v458_v14 = vsel %vm307_vm0, %v100_v3, -inf  ;;  %v459_v15 = vsel %vm307_vm0, %v101_v4, -inf }
  0x2d   :  { %v482_v23 = vmax.f32 %v76_v17, %v481_v19  ;;  %v519_v24 = vmax.f32 %v77_v18, %v518_v20  ;;  %v460_v18 = vmax.f32 %v26_v60, %v30_v0  ;;  %v497_v19 = vmax.f32 %v27_v61, %v31_v5 }
  0x2f   :  { %v483_v27 = vmax.f32 %v78_v21, %v482_v23  ;;  %v520_v28 = vmax.f32 %v79_v22, %v519_v24  ;;  %v461_v22 = vmax.f32 %v28_v8, %v32_v12  ;;  %v498_v23 = vmax.f32 %v29_v11, %v33_v13 }
  0x31   :  { %v484_v31 = vmax.f32 %v80_v25, %v483_v27  ;;  %v521_v32 = vmax.f32 %v81_v26, %v520_v28 }
  0x33   :  { %v485_v35 = vmax.f32 %v82_v29, %v484_v31  ;;  %v522_v36 = vmax.f32 %v83_v30, %v521_v32 }
  0x35   :  { %v486_v40 = vmax.f32 %v84_v33, %v485_v35  ;;  %v523_v41 = vmax.f32 %v85_v34, %v522_v36  ;;  %v561_v34 = vsub.s32 0, %v193_v46  ;;  %v565_v35 = vsub.s32 1, %v193_v46  ;;  %v557_v36 = vld [vmem:[%s943_s1] sm:$0x3]  ;;  %s672_s1 = smov [#allocation4]  }
  0x36   :  { %v577_v46 = vld [vmem:[#allocation3] sm:$0x1]  ;;  %s597_s8 = sshll.u32 %s672_s1, 4  ;;  %s598_s8 = int_to_ptr.vmem [resolvable:$true] %s597_s8 }
  0x37   :  { %v487_v44 = vmax.f32 %v86_v38, %v486_v40  ;;  %v524_v45 = vmax.f32 %v87_v39, %v523_v41  ;;  %v562_v41 = vrot.slane %v557_v36, %v561_v34  ;;  %s628_s11 = scalar_lea.vmem %s598_s8, 16  ;;  %s632_s12 = scalar_lea.vmem %s598_s8, 32 }
  0x38   :  { %p629_p0 = scmp.ne.s32.totalorder %s598_s8, %s628_s11  ;;  %p633_p1 = scmp.lt.s32.totalorder %s598_s8, %s598_s8 }
  0x39   :  { %v488_v49 = vmax.f32 %v88_v42, %v487_v44  ;;  %v525_v50 = vmax.f32 %v89_v43, %v524_v45  ;;  %v566_v42 = vrot.slane %v557_v36, %v565_v35  ;;  %p634_p2 = scmp.lt.s32.totalorder %s632_s12, %s628_s11 }
  0x3b   :  { %v489_v53 = vmax.f32 %v90_v47, %v488_v49  ;;  %v526_v54 = vmax.f32 %v91_v48, %v525_v50  ;;  %p635_p3 = por %p634_p2, %p633_p1 }
  0x3d   :  { %v490_v58 = vmax.f32 %v92_v51, %v489_v53  ;;  %v527_v59 = vmax.f32 %v93_v52, %v526_v54  ;;  %p636_p4 = pnand %p635_p3, %p629_p0 }
  0x3f   :  { %v491_v1 = vmax.f32 %v94_v56, %v490_v58  ;;  %v528_v2 = vmax.f32 %v95_v57, %v527_v59 }
  0x41   :  { %v492_v9 = vmax.f32 %v96_v62, %v491_v1  ;;  %v529_v10 = vmax.f32 %v97_v63, %v528_v2 }
  0x43   :  { %v493_v16 = vmax.f32 %v98_v6, %v492_v9  ;;  %v530_v17 = vmax.f32 %v99_v7, %v529_v10 }
  0x45   :  { %v494_v20 = vmax.f32 %v458_v14, %v493_v16  ;;  %v531_v21 = vmax.f32 %v459_v15, %v530_v17 }
  0x47   :  { %v495_v24 = vmax.f32 %v460_v18, %v494_v20  ;;  %v532_v25 = vmax.f32 %v497_v19, %v531_v21 }
  0x49   :  { %v496_v26 = vmax.f32 %v461_v22, %v495_v24  ;;  %v533_v27 = vmax.f32 %v498_v23, %v532_v25 }
  0x4b   :  { %v545_v28 = vrot.slane %v496_v26, 4  ;;  %v551_v29 = vrot.slane %v533_v27, 4 }
  0x4d   :  { %v546_v30 = vmax.f32 %v496_v26, %v545_v28  ;;  %v552_v31 = vmax.f32 %v533_v27, %v551_v29 }
  0x4f   :  { %v547_v32 = vrot.slane %v546_v30, 2  ;;  %v553_v33 = vrot.slane %v552_v31, 2 }
  0x51   :  { %v548_v37 = vmax.f32 %v546_v30, %v547_v32  ;;  %v554_v38 = vmax.f32 %v552_v31, %v553_v33 }
  0x53   :  { %v549_v39 = vrot.slane %v548_v37, 1  ;;  %v555_v40 = vrot.slane %v554_v38, 1 }
  0x55   :  { %v550_v43 = vmax.f32 %v548_v37, %v549_v39  ;;  %v556_v44 = vmax.f32 %v554_v38, %v555_v40 }
  0x57   :  { %v569_v45 = vmul.f32 %v562_v41, %v550_v43  ;;  %v570_v47 = vmul.f32 %v566_v42, %v556_v44 }
  0x59   :  { %v572_v48 = vsel %vm571_vm1, %v569_v45, 0.0  ;;  %v573_v49 = vsel %vm571_vm1, %v570_v47, 0.0 }
  0x5a   :  { %v574_v50 = vadd.f32 %v573_v49, %v572_v48 }
  0x5c   :  { %575 = vadd.xlane.f32.xlu0 %v574_v50 }
  0xe5   :  { %v576_v51 = vpop.xlane.xlu0 %575 }
  0xe6   :  { %v578_v52 = vadd.f32 %v577_v46, %v576_v51 }
  0xe8   :  { %v619_v53 = vmul.f32 -1.442695, %v578_v52 }
  0xea   :  { %624 = vpow2.f32 %v619_v53 }
  0xf7   :  { %v625_v54 = vpop.eup %624 }
  0xf8   :  { %v582_v55 = vadd.f32 1.0, %v625_v54 }
  0xfa   :  { %626 = vrcp.f32 %v582_v55 }
 0x107   :  { %v627_v56 = vpop.eup %626 }
 0x108   :  { %586 = vst.msk [vmem:[#allocation4] sm:$0x1] %vm585_vm2, %v627_v56  ;;  %vm587_vm3 = vcmp.ge.f32.partialorder %v627_v56, 0.5 }
 0x109   :  { %639 = shalt.err (!%p636_p4)
}
 0x10a   :  { %600 = dma.vmem_to_hbm [thread:$0]  %s598_s8, 16, %s945_s3, [#allocation5]   ;;  %v674_v57 = vmov 0.0  }
 0x10b   :  { %v620_v58 = vsel %vm587_vm3, 1.0, %v674_v57  ;;  %s648_s15 = scalar_lea.vmem %s608_s10, 16  ;;  %s652_s16 = scalar_lea.vmem %s608_s10, 32 }
 0x10c   :  { %590 = vst.msk [vmem:[#allocation6] sm:$0x1] %vm585_vm2, %v620_v58  ;;  %p649_p5 = scmp.ne.s32.totalorder %s608_s10, %s648_s15  ;;  %p653_p6 = scmp.lt.s32.totalorder %s608_s10, %s608_s10 }
 0x10d   :  { %p654_p7 = scmp.lt.s32.totalorder %s652_s16, %s648_s15 }
 0x10f   :  { %p655_p8 = por %p654_p7, %p653_p6 }
 0x111   :  { %p656_p9 = pnand %p655_p8, %p649_p5 }
 0x113   :  { %659 = shalt.err (!%p656_p9)
}
 0x114   :  { %610 = dma.vmem_to_hbm [thread:$0]  %s608_s10, 16, %s946_s4, [#allocation7]  }
 0x115   :  { %668 = dma.done.wait [#allocation5], 16  }
 0x116   :  { %669 = vsyncadd [#allocation5], 4294967280 }
 0x117   :  { %670 = dma.done.wait [#allocation7], 16  }
 0x118   :  { %671 = vsyncadd [#allocation7], 4294967280 }
 0x119   :  { %617 = vsyncpa [#allocation5], 1 }
 0x11a   :  { %618 = vsyncpa [#allocation7], 1 }

</bundles_post_ra>
